<compile_context>
chip_gen: v7x
topology: tpu7x:2x2x1
jax: 0.10.0
libtpu: 0.0.40
codegen_flags: <defaults>
</compile_context>

<pallas_src>
import functools

import jax
import jax.numpy as jnp
from jax import lax
from jax.experimental import pallas as pl
from jax.experimental.pallas import tpu as pltpu

EPS = 1e-5  # PyTorch BatchNorm1d default


def _round_up(v, m):
    return ((v + m - 1) // m) * m


def _pick_layer_chunk(num_layers, max_chunk=4):
    """Largest chunk <= max_chunk that divides the tower depth."""
    for cand in range(min(max_chunk, num_layers), 0, -1):
        if num_layers % cand == 0:
            return cand
    return 1


def resblock_tower_kernel(x_hbm, w1t_ref, w2t_ref, bn_ref, out_ref, copy_sem,
                          *, l_chunk, n_true):
    """One grid step == L_CHUNK ResBlocks; activation lives in out_ref (VMEM).

    x_hbm   : (n_pad, c_pad) f32   input, left in HBM (memory_space=pl.ANY)
    w1t_ref : (l_chunk, c_pad, c_pad) bf16   W1.T per layer of this chunk
    w2t_ref : (l_chunk, c_pad, c_pad) bf16   W2.T per layer of this chunk
    bn_ref  : (l_chunk, 8, c_pad) f32  rows 0..3 = gamma1, beta1, gamma2, beta2
    out_ref : (n_pad, c_pad) f32   resident activation / final output
    copy_sem: scalar DMA semaphore (scratch)
    """
    n_pad = out_ref.shape[0]

    # One-shot HBM -> VMEM copy of the input into the resident activation
    # block (x is only needed at step 0; no resident x block is pinned).
    @pl.when(pl.program_id(0) == 0)
    def _():
        cp = pltpu.make_async_copy(x_hbm, out_ref, copy_sem)
        cp.start()
        cp.wait()

    # Row mask (only materialized when the batch was padded): keeps padded
    # rows at exactly zero so BN batch statistics stay those of the true batch.
    if n_pad != n_true:
        row = lax.broadcasted_iota(jnp.int32, (n_pad, 1), 0)
        row_mask = (row < n_true).astype(jnp.float32)
    else:
        row_mask = None

    inv_n = 1.0 / float(n_true)

    def bn_train(h, gamma, beta):
        # Train-mode BatchNorm1d over the TRUE batch; single-pass statistics
        # with folded scale/shift.  Padded rows/channels of h are exact zeros,
        # so plain sums are exact; divide by the true batch size.
        s1 = jnp.sum(h, axis=0, keepdims=True)                 # (1, c_pad)
        s2 = jnp.sum(h * h, axis=0, keepdims=True)             # (1, c_pad)
        mu = s1 * inv_n
        var = jnp.maximum(s2 * inv_n - mu * mu, 0.0)           # clamp (review)
        scale = gamma * lax.rsqrt(var + EPS)                   # EUP rsqrt
        shift = beta - mu * scale
        out = h * scale + shift                                # one FMA / elem
        if row_mask is not None:
            out = out * row_mask                               # re-zero pad rows
        return out

    # Unrolled layer loop over this chunk (l_chunk is a small static int, so a
    # Python loop == lax.fori_loop(unroll=True) with fully static ref indices).
    for ll in range(l_chunk):
        xin = out_ref[...]                                     # (n_pad, c_pad)
        bn_l = bn_ref[ll]                                      # (8, c_pad)
        g1, be1 = bn_l[0:1, :], bn_l[1:2, :]
        g2, be2 = bn_l[2:3, :], bn_l[3:4, :]

        # conv1 (Linear, bias cancelled by train-mode BN) + bn1 + relu
        h1 = jnp.dot(xin.astype(jnp.bfloat16), w1t_ref[ll],
                     preferred_element_type=jnp.float32)
        h1 = jnp.maximum(bn_train(h1, g1, be1), 0.0)

        # conv2 (Linear, bias cancelled by train-mode BN) + bn2
        h2 = jnp.dot(h1.astype(jnp.bfloat16), w2t_ref[ll],
                     preferred_element_type=jnp.float32)
        h2 = bn_train(h2, g2, be2)

        # residual + relu
        out_ref[...] = jnp.maximum(h2 + xin, 0.0)


def resblock_tower_forward(x, params, *, max_layer_chunk=4):
    """Run a stack of ResBlocks in ONE pallas_call.

    x: (N, C) f32 (true, unpadded shapes).
    params: dict from init_tower_params (kernel arrays already channel-padded).
    """
    n, c = x.shape
    w1t = params["w1t"]
    num_layers, c_pad, _ = w1t.shape

    n_pad = _round_up(max(n, 1), 16)       # bf16 sublane packing
    x_pad = jnp.zeros((n_pad, c_pad), jnp.float32).at[:n, :c].set(
        x.astype(jnp.float32))

    l_chunk = _pick_layer_chunk(num_layers, max_layer_chunk)
    grid = (num_layers // l_chunk,)

    kernel = functools.partial(resblock_tower_kernel,
                               l_chunk=l_chunk, n_true=n)

    out_pad = pl.pallas_call(
        kernel,
        out_shape=jax.ShapeDtypeStruct((n_pad, c_pad), jnp.float32),
        grid=grid,
        in_specs=[
            # Input stays in HBM; copied once into the resident output block.
            pl.BlockSpec(memory_space=pl.ANY),
            # Per-chunk weights: index_map walks the layer-chunk axis ->
            # default double-buffered prefetch of the next chunk's weights.
            pl.BlockSpec((l_chunk, c_pad, c_pad), lambda i: (i, 0, 0)),
            pl.BlockSpec((l_chunk, c_pad, c_pad), lambda i: (i, 0, 0)),
            # All per-channel BN params of a chunk in one (l_chunk, 8, c_pad) tile.
            pl.BlockSpec((l_chunk, 8, c_pad), lambda i: (i, 0, 0)),
        ],
        # Constant block index: the output block stays resident in VMEM across
        # all grid steps (it IS the activation) and is written to HBM once.
        out_specs=pl.BlockSpec((n_pad, c_pad), lambda i: (0, 0)),
        scratch_shapes=[pltpu.SemaphoreType.DMA(())],
        compiler_params=pltpu.CompilerParams(
            dimension_semantics=("arbitrary",)),   # layer axis is sequential
        cost_estimate=pl.CostEstimate(
            flops=4 * n_pad * c_pad * c_pad * num_layers,
            transcendentals=2 * c_pad * num_layers,
            bytes_accessed=(2 * n_pad * c_pad * 4
                            + num_layers * 2 * c_pad * c_pad * 2
                            + num_layers * 8 * c_pad * 4),
        ),
    )(x_pad, params["w1t"], params["w2t"], params["bn"])

    return out_pad[:n, :c]


def init_tower_params(key, channels, num_blocks, *, lane_multiple=128):
    """Mirror nn.Linear (U(+/-1/sqrt(C))) / nn.BatchNorm1d parameters.

    Kernel arrays are channel-padded to `lane_multiple`, weights transposed
    once here and stored bf16 for the MXU.  True-width f32 copies (and the
    biases, which train-mode BN cancels) are kept for the pure-JAX reference.
    gamma/beta are randomized slightly to exercise the affine path (a fresh
    PyTorch module would have gamma=1, beta=0 -- same forward semantics).
    """
    c = channels
    c_pad = _round_up(c, lane_multiple)
    bound = 1.0 / (c ** 0.5)

    def uni(k, shape):
        return jax.random.uniform(k, shape, jnp.float32,
                                  minval=-bound, maxval=bound)

    w1s, b1s, w2s, b2s = [], [], [], []
    g1s, be1s, g2s, be2s = [], [], [], []
    w1t_p, w2t_p, bn_p = [], [], []
    for _ in range(num_blocks):
        key, k1, k2, k3, k4, k5, k6, k7, k8 = jax.random.split(key, 9)
        w1, b1 = uni(k1, (c, c)), uni(k2, (c,))        # PyTorch layout (out, in)
        w2, b2 = uni(k3, (c, c)), uni(k4, (c,))
        g1 = 1.0 + 0.1 * jax.random.normal(k5, (c,), jnp.float32)
        be1 = 0.1 * jax.random.normal(k6, (c,), jnp.float32)
        g2 = 1.0 + 0.1 * jax.random.normal(k7, (c,), jnp.float32)
        be2 = 0.1 * jax.random.normal(k8, (c,), jnp.float32)

        w1s.append(w1); b1s.append(b1); w2s.append(w2); b2s.append(b2)
        g1s.append(g1); be1s.append(be1); g2s.append(g2); be2s.append(be2)

        # Transpose ONCE at init, zero-pad to lane-dense width.
        w1t_p.append(jnp.zeros((c_pad, c_pad), jnp.float32).at[:c, :c].set(w1.T))
        w2t_p.append(jnp.zeros((c_pad, c_pad), jnp.float32).at[:c, :c].set(w2.T))

        bn = jnp.zeros((8, c_pad), jnp.float32)        # padded gammas/betas = 0
        bn = bn.at[0, :c].set(g1).at[1, :c].set(be1)
        bn = bn.at[2, :c].set(g2).at[3, :c].set(be2)
        bn_p.append(bn)

    return dict(
        # kernel inputs (channel-padded, MXU-ready)
        w1t=jnp.stack(w1t_p).astype(jnp.bfloat16),
        w2t=jnp.stack(w2t_p).astype(jnp.bfloat16),
        bn=jnp.stack(bn_p),
        # reference-only (true width, PyTorch layout / precision)
        w1=jnp.stack(w1s), b1=jnp.stack(b1s),
        w2=jnp.stack(w2s), b2=jnp.stack(b2s),
        gamma1=jnp.stack(g1s), beta1=jnp.stack(be1s),
        gamma2=jnp.stack(g2s), beta2=jnp.stack(be2s),
    )


def resblock_tower_ref(x, params, *, match_mxu_precision=True):
    """Pure-JAX reference with full PyTorch semantics: Linear WITH bias,
    two-pass train-mode BN, relu, residual.  match_mxu_precision=True casts
    matmul operands to bf16 (like the kernel's MXU path); False keeps f32."""
    w1, b1, w2, b2 = params["w1"], params["b1"], params["w2"], params["b2"]
    g1, be1 = params["gamma1"], params["beta1"]
    g2, be2 = params["gamma2"], params["beta2"]
    num_blocks = w1.shape[0]

    def bn(h, g, b):
        mu = jnp.mean(h, axis=0, keepdims=True)
        var = jnp.mean((h - mu) ** 2, axis=0, keepdims=True)
        return (h - mu) * lax.rsqrt(var + EPS) * g[None, :] + b[None, :]

    def mm(a, w):  # PyTorch Linear: a @ w.T
        if match_mxu_precision:
            return jnp.dot(a.astype(jnp.bfloat16), w.T.astype(jnp.bfloat16),
                           preferred_element_type=jnp.float32)
        return jnp.dot(a, w.T)

    h = x
    for l in range(num_blocks):
        a1 = jnp.maximum(bn(mm(h, w1[l]) + b1[l], g1[l], be1[l]), 0.0)
        a2 = bn(mm(a1, w2[l]) + b2[l], g2[l], be2[l])
        h = jnp.maximum(a2 + h, 0.0)
    return h


if __name__ == "__main__":
    key = jax.random.PRNGKey(0)
    kx, kp1, kp3, kp6 = jax.random.split(key, 4)

    # Small shapes, deliberately off lane/sublane multiples so the padding +
    # true-batch BN-statistics path is exercised (N=13 -> pad 16, C=32 -> 128).
    N, C = 13, 32
    x = jax.random.normal(kx, (N, C), jnp.float32)

    # Tolerances: the kernel and the bf16-matched reference can re-round their
    # (independently computed, ~1e-7-apart) f32 activations to different bf16
    # values at a cast boundary, giving rare ~1e-3-level element deviations;
    # any real kernel bug produces O(0.1 - 1) errors, so 5e-3 is still strict.
    ATOL = RTOL = 5e-3

    # (a) the exact module: a single ResBlock (tower of length 1).
    p1 = init_tower_params(kp1, C, num_blocks=1)
    out1 = jax.block_until_ready(resblock_tower_forward(x, p1))
    ref1 = resblock_tower_ref(x, p1)
    assert out1.shape == (N, C)
    assert jnp.allclose(out1, ref1, atol=ATOL, rtol=RTOL), "single-block mismatch"

    # (b) fused tower, single grid step (L=3 -> chunk of 3 layers).
    p3 = init_tower_params(kp3, C, num_blocks=3)
    out3 = jax.block_until_ready(resblock_tower_forward(x, p3))
    ref3 = resblock_tower_ref(x, p3)
    assert jnp.allclose(out3, ref3, atol=ATOL, rtol=RTOL), "3-block tower mismatch"

    # Loose sanity vs a full-f32 (PyTorch-precision) reference: documents that
    # the bf16 MXU path only perturbs the output at the bf16-rounding level.
    ref3_f32 = resblock_tower_ref(x, p3, match_mxu_precision=False)
    assert jnp.allclose(out3, ref3_f32, atol=1e-1, rtol=1e-1), "f32 drift too large"

    # (c) chunked tower: L=6 -> chunk 3, grid=(2,); activation stays resident
    # in VMEM across grid steps while the next chunk's weights are prefetched.
    p6 = init_tower_params(kp6, C, num_blocks=6)
    out6 = jax.block_until_ready(resblock_tower_forward(x, p6))
    ref6 = resblock_tower_ref(x, p6)
    assert jnp.allclose(out6, ref6, atol=ATOL, rtol=RTOL), "6-block tower mismatch"

    print("KERNEL_OK")
</pallas_src>

<mosaic_0001>
module attributes {stable_mosaic.version = 11 : i64} {
  func.func @resblock_tower_kernel(%arg0: i32, %arg1: memref<16x128xf32, #tpu.memory_space<any>>, %arg2: memref<1x128x128xbf16, #tpu.memory_space<vmem>>, %arg3: memref<1x128x128xbf16, #tpu.memory_space<vmem>>, %arg4: memref<1x8x128xf32, #tpu.memory_space<vmem>>, %arg5: memref<16x128xf32, #tpu.memory_space<vmem>>, %arg6: memref<!tpu.dma_semaphore, #tpu.memory_space<semaphore_mem>>) attributes {dimension_semantics = [#tpu.dimension_semantics<arbitrary>], iteration_bounds = array<i64: 1>, scalar_prefetch = 0 : i64, scratch_operands = 1 : i64, tpu.core_type = #tpu.core_type<tc>, window_params = [{}, {transform_indices = @transform_1, window_bounds = array<i64: 1, 128, 128>}, {transform_indices = @transform_2, window_bounds = array<i64: 1, 128, 128>}, {transform_indices = @transform_3, window_bounds = array<i64: 1, 8, 128>}, {pipeline_mode = #tpu.pipeline_mode<synchronous>, transform_indices = @transform_4, window_bounds = array<i64: 16, 128>}]} {
    %c0_i32 = arith.constant 0 : i32
    %0 = arith.cmpi eq, %arg0, %c0_i32 : i32
    %1 = arith.extui %0 : i1 to i32
    %c0_i32_0 = arith.constant 0 : i32
    %2 = arith.cmpi ne, %1, %c0_i32_0 : i32
    scf.if %2 {
      tpu.enqueue_dma source(%arg1 : memref<16x128xf32, #tpu.memory_space<any>>) target(%arg5 : memref<16x128xf32, #tpu.memory_space<vmem>>) target_semaphore(%arg6 : memref<!tpu.dma_semaphore, #tpu.memory_space<semaphore_mem>>)
      tpu.wait_dma2 semaphore(%arg6 : memref<!tpu.dma_semaphore, #tpu.memory_space<semaphore_mem>>) src(%arg1 : memref<16x128xf32, #tpu.memory_space<any>>) dst(%arg5 : memref<16x128xf32, #tpu.memory_space<vmem>>)
    } else {
    }
    %3 = tpu.iota {dimensions = array<i32: 0>} : vector<16x1xi32>
    %c13_i32 = arith.constant 13 : i32
    %4 = vector.broadcast %c13_i32 : i32 to vector<16x1xi32>
    %5 = arith.cmpi slt, %3, %4 : vector<16x1xi32>
    %6 = arith.extui %5 : vector<16x1xi1> to vector<16x1xi32>
    %7 = arith.sitofp %6 : vector<16x1xi32> to vector<16x1xf32>
    %c0 = arith.constant 0 : index
    %c0_1 = arith.constant 0 : index
    %8 = vector.load %arg5[%c0, %c0_1] : memref<16x128xf32, #tpu.memory_space<vmem>>, vector<16x128xf32>
    %c0_2 = arith.constant 0 : index
    %c0_3 = arith.constant 0 : index
    %c0_4 = arith.constant 0 : index
    %9 = vector.load %arg4[%c0_2, %c0_3, %c0_4] : memref<1x8x128xf32, #tpu.memory_space<vmem>>, vector<1x8x128xf32>
    %10 = vector.shape_cast %9 : vector<1x8x128xf32> to vector<8x128xf32>
    %11 = vector.extract_strided_slice %10 {offsets = [0, 0], sizes = [1, 128], strides = [1, 1]} : vector<8x128xf32> to vector<1x128xf32>
    %12 = vector.extract_strided_slice %10 {offsets = [1, 0], sizes = [1, 128], strides = [1, 1]} : vector<8x128xf32> to vector<1x128xf32>
    %13 = vector.extract_strided_slice %10 {offsets = [2, 0], sizes = [1, 128], strides = [1, 1]} : vector<8x128xf32> to vector<1x128xf32>
    %14 = vector.extract_strided_slice %10 {offsets = [3, 0], sizes = [1, 128], strides = [1, 1]} : vector<8x128xf32> to vector<1x128xf32>
    %15 = arith.truncf %8 : vector<16x128xf32> to vector<16x128xbf16>
    %c0_5 = arith.constant 0 : index
    %c0_6 = arith.constant 0 : index
    %c0_7 = arith.constant 0 : index
    %16 = vector.load %arg2[%c0_5, %c0_6, %c0_7] : memref<1x128x128xbf16, #tpu.memory_space<vmem>>, vector<1x128x128xbf16>
    %17 = vector.shape_cast %16 : vector<1x128x128xbf16> to vector<128x128xbf16>
    %cst = arith.constant dense<0.000000e+00> : vector<16x128xf32>
    %18 = tpu.matmul %15, %17, %cst {dimension_numbers = #tpu.dot_dimension_numbers<[1], [0], [0], [1], [0, 0, 1, 1], [], []>} : vector<16x128xbf16>, vector<128x128xbf16>, vector<16x128xf32> -> vector<16x128xf32>
    %cst_8 = arith.constant dense<0.000000e+00> : vector<128xf32>
    %19 = vector.multi_reduction <add>, %18, %cst_8 [0] : vector<16x128xf32> to vector<128xf32>
    %20 = vector.shape_cast %19 : vector<128xf32> to vector<1x128xf32>
    %21 = arith.mulf %18, %18 : vector<16x128xf32>
    %cst_9 = arith.constant dense<0.000000e+00> : vector<128xf32>
    %22 = vector.multi_reduction <add>, %21, %cst_9 [0] : vector<16x128xf32> to vector<128xf32>
    %23 = vector.shape_cast %22 : vector<128xf32> to vector<1x128xf32>
    %cst_10 = arith.constant 0.0769230798 : f32
    %24 = vector.broadcast %cst_10 : f32 to vector<1x128xf32>
    %25 = arith.mulf %20, %24 : vector<1x128xf32>
    %cst_11 = arith.constant 0.0769230798 : f32
    %26 = vector.broadcast %cst_11 : f32 to vector<1x128xf32>
    %27 = arith.mulf %23, %26 : vector<1x128xf32>
    %28 = arith.mulf %25, %25 : vector<1x128xf32>
    %29 = arith.subf %27, %28 : vector<1x128xf32>
    %cst_12 = arith.constant 0.000000e+00 : f32
    %30 = vector.broadcast %cst_12 : f32 to vector<1x128xf32>
    %31 = arith.maximumf %29, %30 : vector<1x128xf32>
    %cst_13 = arith.constant 9.99999974E-6 : f32
    %32 = vector.broadcast %cst_13 : f32 to vector<1x128xf32>
    %33 = arith.addf %31, %32 : vector<1x128xf32>
    %34 = math.rsqrt %33 : vector<1x128xf32>
    %35 = arith.mulf %11, %34 : vector<1x128xf32>
    %36 = arith.mulf %25, %35 : vector<1x128xf32>
    %37 = arith.subf %12, %36 : vector<1x128xf32>
    %38 = vector.broadcast %35 : vector<1x128xf32> to vector<16x128xf32>
    %39 = arith.mulf %18, %38 : vector<16x128xf32>
    %40 = vector.broadcast %37 : vector<1x128xf32> to vector<16x128xf32>
    %41 = arith.addf %39, %40 : vector<16x128xf32>
    %42 = vector.broadcast %7 : vector<16x1xf32> to vector<16x128xf32>
    %43 = arith.mulf %41, %42 : vector<16x128xf32>
    %cst_14 = arith.constant 0.000000e+00 : f32
    %44 = vector.broadcast %cst_14 : f32 to vector<16x128xf32>
    %45 = arith.maximumf %43, %44 : vector<16x128xf32>
    %46 = arith.truncf %45 : vector<16x128xf32> to vector<16x128xbf16>
    %c0_15 = arith.constant 0 : index
    %c0_16 = arith.constant 0 : index
    %c0_17 = arith.constant 0 : index
    %47 = vector.load %arg3[%c0_15, %c0_16, %c0_17] : memref<1x128x128xbf16, #tpu.memory_space<vmem>>, vector<1x128x128xbf16>
    %48 = vector.shape_cast %47 : vector<1x128x128xbf16> to vector<128x128xbf16>
    %cst_18 = arith.constant dense<0.000000e+00> : vector<16x128xf32>
    %49 = tpu.matmul %46, %48, %cst_18 {dimension_numbers = #tpu.dot_dimension_numbers<[1], [0], [0], [1], [0, 0, 1, 1], [], []>} : vector<16x128xbf16>, vector<128x128xbf16>, vector<16x128xf32> -> vector<16x128xf32>
    %cst_19 = arith.constant dense<0.000000e+00> : vector<128xf32>
    %50 = vector.multi_reduction <add>, %49, %cst_19 [0] : vector<16x128xf32> to vector<128xf32>
    %51 = vector.shape_cast %50 : vector<128xf32> to vector<1x128xf32>
    %52 = arith.mulf %49, %49 : vector<16x128xf32>
    %cst_20 = arith.constant dense<0.000000e+00> : vector<128xf32>
    %53 = vector.multi_reduction <add>, %52, %cst_20 [0] : vector<16x128xf32> to vector<128xf32>
    %54 = vector.shape_cast %53 : vector<128xf32> to vector<1x128xf32>
    %cst_21 = arith.constant 0.0769230798 : f32
    %55 = vector.broadcast %cst_21 : f32 to vector<1x128xf32>
    %56 = arith.mulf %51, %55 : vector<1x128xf32>
    %cst_22 = arith.constant 0.0769230798 : f32
    %57 = vector.broadcast %cst_22 : f32 to vector<1x128xf32>
    %58 = arith.mulf %54, %57 : vector<1x128xf32>
    %59 = arith.mulf %56, %56 : vector<1x128xf32>
    %60 = arith.subf %58, %59 : vector<1x128xf32>
    %cst_23 = arith.constant 0.000000e+00 : f32
    %61 = vector.broadcast %cst_23 : f32 to vector<1x128xf32>
    %62 = arith.maximumf %60, %61 : vector<1x128xf32>
    %cst_24 = arith.constant 9.99999974E-6 : f32
    %63 = vector.broadcast %cst_24 : f32 to vector<1x128xf32>
    %64 = arith.addf %62, %63 : vector<1x128xf32>
    %65 = math.rsqrt %64 : vector<1x128xf32>
    %66 = arith.mulf %13, %65 : vector<1x128xf32>
    %67 = arith.mulf %56, %66 : vector<1x128xf32>
    %68 = arith.subf %14, %67 : vector<1x128xf32>
    %69 = vector.broadcast %66 : vector<1x128xf32> to vector<16x128xf32>
    %70 = arith.mulf %49, %69 : vector<16x128xf32>
    %71 = vector.broadcast %68 : vector<1x128xf32> to vector<16x128xf32>
    %72 = arith.addf %70, %71 : vector<16x128xf32>
    %73 = vector.broadcast %7 : vector<16x1xf32> to vector<16x128xf32>
    %74 = arith.mulf %72, %73 : vector<16x128xf32>
    %75 = arith.addf %74, %8 : vector<16x128xf32>
    %cst_25 = arith.constant 0.000000e+00 : f32
    %76 = vector.broadcast %cst_25 : f32 to vector<16x128xf32>
    %77 = arith.maximumf %75, %76 : vector<16x128xf32>
    %c0_26 = arith.constant 0 : index
    %c0_27 = arith.constant 0 : index
    %78 = vector.load %arg5[%c0_26, %c0_27] : memref<16x128xf32, #tpu.memory_space<vmem>>, vector<16x128xf32>
    tpu.vector_store %arg5[%c0_26, %c0_27], %77 {strides = array<i32>} : memref<16x128xf32, #tpu.memory_space<vmem>>, vector<16x128xf32>,
    return
  }
  func.func @transform_1(%arg0: i32) -> (i32, i32, i32) {
    %c0_i32 = arith.constant 0 : i32
    %c0_i32_0 = arith.constant 0 : i32
    %c0_i32_1 = arith.constant 0 : i32
    return %arg0, %c0_i32, %c0_i32_0 : i32, i32, i32
  }
  func.func @transform_2(%arg0: i32) -> (i32, i32, i32) {
    %c0_i32 = arith.constant 0 : i32
    %c0_i32_0 = arith.constant 0 : i32
    %c0_i32_1 = arith.constant 0 : i32
    return %arg0, %c0_i32, %c0_i32_0 : i32, i32, i32
  }
  func.func @transform_3(%arg0: i32) -> (i32, i32, i32) {
    %c0_i32 = arith.constant 0 : i32
    %c0_i32_0 = arith.constant 0 : i32
    %c0_i32_1 = arith.constant 0 : i32
    return %arg0, %c0_i32, %c0_i32_0 : i32, i32, i32
  }
  func.func @transform_4(%arg0: i32) -> (i32, i32) {
    %c0_i32 = arith.constant 0 : i32
    %c0_i32_0 = arith.constant 0 : i32
    %c0_i32_1 = arith.constant 0 : i32
    return %c0_i32, %c0_i32_0 : i32, i32
  }
}

</mosaic_0001>

<bundles_post_ra>
// kernel: tpu_custom_call.1
= control target key start
LH: loop header
LB: loop body
LE: loop exit
PB: predicated region body
PF: predicated region fallthrough
CT: control target
= control target key end

     0   :  { %9 = vsyncpa [#allocation4], 0  ;;  %s734_s0 = inlined_call_operand.hbm [shape: f32[16,128], index: 0, kind: input, shape index: {}]   ;;  %s735_s1 = inlined_call_operand.hbm [shape: bf16[1,128,128], index: 1, kind: input, shape index: {}]   ;;  %s736_s2 = inlined_call_operand.hbm [shape: bf16[1,128,128], index: 2, kind: input, shape index: {}]   ;;  %s737_s3 = inlined_call_operand.vmem [shape: f32[1,8,128], index: 3, kind: input, shape index: {}]   ;;  %s738_s4 = inlined_call_operand.hbm [shape: f32[16,128], index: 4, kind: output, shape index: {}]  }
   0x1   :  { %10 = vsyncpa [#allocation7], 0 }
   0x2   :  { %11 = vsyncpa [#allocation5], 0  ;;  %s606_s15 = smov [#allocation3]   ;;  %s510_s19 = scalar_lea.hbm %s735_s1, 1024 }
   0x3   :  { %s17_s16 = sshll.u32 %s606_s15, 4  ;;  %p511_p0 = scmp.ne.s32.totalorder %s735_s1, %s510_s19  ;;  %s18_s16 = int_to_ptr.vmem [resolvable:$true] %s17_s16 }
   0x4   :  { %p514_p1 = scmp.lt.u32.totalorder %s510_s19, %s735_s1 }
   0x6   :  { %p516_p2 = pnand %p514_p1, %p511_p0 }
   0x8   :  { %519 = shalt.err (!%p516_p2)
}
   0x9   :  { %s520_s24 = scalar_lea.vmem %s18_s16, 1024  ;;  %p525_p4 = scmp.lt.s32.totalorder %s18_s16, %s18_s16 }
   0xa   :  { %p521_p3 = scmp.ne.s32.totalorder %s18_s16, %s520_s24  ;;  %p526_p5 = scmp.lt.s32.totalorder %s520_s24, %s520_s24 }
   0xc   :  { %p527_p6 = por %p526_p5, %p525_p4 }
   0xe   :  { %p528_p7 = pnand %p527_p6, %p521_p3 }
  0x10   :  { %531 = shalt.err (!%p528_p7)
}
  0x11   :  { %s607_s25 = smov 64   ;;  %s608_s26 = smov 4  }
  0x12   :  { %23 = dma.hbm_to_vmem [thread:$0]  %s735_s1, 1024, %s18_s16, [#allocation4], %s607_s25, %s607_s25, %s608_s26  }
  0x13   :  { %s609_s29 = smov [#allocation6]   ;;  %s532_s7 = scalar_lea.hbm %s736_s2, 1024 }
  0x14   :  { %s29_s30 = sshll.u32 %s609_s29, 4  ;;  %p533_p8 = scmp.ne.s32.totalorder %s736_s2, %s532_s7  ;;  %s30_s30 = int_to_ptr.vmem [resolvable:$true] %s29_s30 }
  0x15   :  { %p536_p9 = scmp.lt.u32.totalorder %s532_s7, %s736_s2 }
  0x17   :  { %p538_p10 = pnand %p536_p9, %p533_p8 }
  0x19   :  { %541 = shalt.err (!%p538_p10)
}
  0x1a   :  { %s542_s12 = scalar_lea.vmem %s30_s30, 1024  ;;  %p547_p12 = scmp.lt.s32.totalorder %s30_s30, %s30_s30 }
  0x1b   :  { %p543_p11 = scmp.ne.s32.totalorder %s30_s30, %s542_s12  ;;  %p548_p13 = scmp.lt.s32.totalorder %s542_s12, %s542_s12 }
  0x1d   :  { %p549_p0 = por %p548_p13, %p547_p12 }
  0x1f   :  { %p550_p1 = pnand %p549_p0, %p543_p11 }
  0x21   :  { %553 = shalt.err (!%p550_p1)
}
  0x22   :  { %35 = dma.hbm_to_vmem [thread:$0]  %s736_s2, 1024, %s30_s30, [#allocation7], %s607_s25, %s607_s25, %s608_s26  }
  0x23   :  { %598 = dma.done.wait [#allocation4], 1024  }
  0x24   :  { %599 = vsyncadd [#allocation4], 4294966272 }
  0x25   :  { %600 = dma.done.wait [#allocation7], 1024  }
  0x26   :  { %601 = vsyncadd [#allocation7], 4294966272  ;;  %s610_s14 = smov [#allocation8]   ;;  %s554_s18 = scalar_lea.hbm %s734_s0, 256 }
  0x27   :  { %s56_s15 = sshll.u32 %s610_s14, 4  ;;  %p555_p2 = scmp.ne.s32.totalorder %s734_s0, %s554_s18  ;;  %s664_s15 = int_to_ptr.vmem [resolvable:$true] %s56_s15 }
  0x28   :  { %p558_p3 = scmp.lt.u32.totalorder %s554_s18, %s734_s0 }
  0x2a   :  { %p560_p4 = pnand %p558_p3, %p555_p2 }
  0x2c   :  { %563 = shalt.err (!%p560_p4)  }
  0x2d   :  { %s564_s2 = scalar_lea.vmem %s664_s15, 256  ;;  %p569_p6 = scmp.lt.s32.totalorder %s664_s15, %s664_s15 }
  0x2e   :  { %p565_p5 = scmp.ne.s32.totalorder %s664_s15, %s564_s2  ;;  %p570_p7 = scmp.lt.s32.totalorder %s564_s2, %s564_s2 }
  0x30   :  { %p571_p8 = por %p570_p7, %p569_p6 }
  0x32   :  { %p679_p9 = pnand %p571_p8, %p565_p5 }
  0x34   :  { %575 = shalt.err (!%p679_p9)  }
  0x35   :  { %59 = dma.hbm_to_vmem [thread:$0]  %s734_s0, 256, %s664_s15, [#allocation2] }
  0x36   :  { %602 = dma.done.wait [#allocation2], 256 }
  0x37   :  { %603 = vsyncadd [#allocation2], 4294967040  ;;  %v611_v0 = vmov 0.0   ;;  %vm612_vm0 = vmmov 0   ;;  %v490_v1 = vld [vmem:[#allocation3] sm:$0xff]   ;;  %v491_v2 = vld [vmem:[#allocation3 + $0x8] sm:$0xff]   ;;  %v63_v46 = vlaneseq }
  0x38   :  { %441 = vmatprep.subr.bf16.mxu0 %v611_v0  ;;  %457 = vmatprep.mubr.msk.bf16.mxu0 %vm612_vm0, %v611_v0  ;;  %v492_v3 = vld [vmem:[#allocation3 + $0x10] sm:$0xff]   ;;  %v493_v4 = vld [vmem:[#allocation3 + $0x18] sm:$0xff]   ;;  %v494_v5 = vld [vmem:[#allocation3 + $0x20] sm:$0xff]  }
  0x39   :  { %461 = vmatprep.subr.bf16.mxu1 %v611_v0  ;;  %477 = vmatprep.mubr.msk.bf16.mxu1 %vm612_vm0, %v611_v0  ;;  %v495_v6 = vld [vmem:[#allocation3 + $0x28] sm:$0xff]   ;;  %v496_v7 = vld [vmem:[#allocation3 + $0x30] sm:$0xff]   ;;  %v497_v8 = vld [vmem:[#allocation3 + $0x38] sm:$0xff]   ;;  %v64_v47 = vshrl.u32 %v63_v46, 7 }
  0x3a   :  { %442 = vmatpush3.bf16.msra.mxu0 %v490_v1  ;;  %v699_v9 = vld [vmem:[#allocation8] sm:$0xff]  ;;  %v701_v10 = vld [vmem:[#allocation8 + $0x8] sm:$0xff]  ;;  %v500_v14 = vld [vmem:[#allocation6 + $0x10] sm:$0xff]  }
  0x3b   :  { %443 = vmatprep.subr.bf16.mxu0 %v611_v0  ;;  %v75_v11 = vpack.c.bf16 %v701_v10, %v699_v9  ;;  %v498_v12 = vld [vmem:[#allocation6] sm:$0xff]   ;;  %v499_v13 = vld [vmem:[#allocation6 + $0x8] sm:$0xff]   ;;  %v501_v15 = vld [vmem:[#allocation6 + $0x18] sm:$0xff]   ;;  %v212_v49 = vsub.s32 0, %v64_v47  ;;  %v65_v54 = vadd.s32 8, %v64_v47  ;;  %v218_v58 = vsub.s32 1, %v64_v47 }
  0x3c   :  { %462 = vmatpush3.bf16.msra.mxu1 %v498_v12  ;;  %v502_v16 = vld [vmem:[#allocation6 + $0x20] sm:$0xff]   ;;  %v503_v17 = vld [vmem:[#allocation6 + $0x28] sm:$0xff]   ;;  %v504_v18 = vld [vmem:[#allocation6 + $0x30] sm:$0xff]  }
  0x3d   :  { %463 = vmatprep.subr.bf16.mxu1 %v611_v0  ;;  %v505_v19 = vld [vmem:[#allocation6 + $0x38] sm:$0xff]   ;;  %v74_v48 = vld [vmem:[%s737_s3] sm:$0xff]  ;;  %vm67_vm1 = vcmp.lt.s32.totalorder %v65_v54, 13 }
  0x3e   :  { %444 = vmatpush3.bf16.msra.mxu0 %v491_v2  ;;  %v405_v61 = vsel %vm67_vm1, 1.0, %v611_v0 }
  0x3f   :  { %445 = vmatprep.subr.bf16.mxu0 %v611_v0 }
  0x40   :  { %464 = vmatpush3.bf16.msra.mxu1 %v499_v13 }
  0x41   :  { %465 = vmatprep.subr.bf16.mxu1 %v611_v0 }
  0x42   :  { %446 = vmatpush3.bf16.msra.mxu0 %v492_v3 }
  0x43   :  { %447 = vmatprep.subr.bf16.mxu0 %v611_v0 }
  0x44   :  { %466 = vmatpush3.bf16.msra.mxu1 %v500_v14 }
  0x45   :  { %467 = vmatprep.subr.bf16.mxu1 %v611_v0 }
  0x46   :  { %448 = vmatpush3.bf16.msra.mxu0 %v493_v4 }
  0x47   :  { %449 = vmatprep.subr.bf16.mxu0 %v611_v0 }
  0x48   :  { %468 = vmatpush3.bf16.msra.mxu1 %v501_v15 }
  0x49   :  { %469 = vmatprep.subr.bf16.mxu1 %v611_v0 }
  0x4a   :  { %450 = vmatpush3.bf16.msra.mxu0 %v494_v5 }
  0x4b   :  { %451 = vmatprep.subr.bf16.mxu0 %v611_v0 }
  0x4c   :  { %470 = vmatpush3.bf16.msra.mxu1 %v502_v16 }
  0x4d   :  { %471 = vmatprep.subr.bf16.mxu1 %v611_v0 }
  0x4e   :  { %452 = vmatpush3.bf16.msra.mxu0 %v495_v6 }
  0x4f   :  { %453 = vmatprep.subr.bf16.mxu0 %v611_v0 }
  0x50   :  { %472 = vmatpush3.bf16.msra.mxu1 %v503_v17 }
  0x51   :  { %473 = vmatprep.subr.bf16.mxu1 %v611_v0 }
  0x52   :  { %454 = vmatpush3.bf16.msra.mxu0 %v496_v7 }
  0x53   :  { %455 = vmatprep.subr.bf16.mxu0 %v611_v0 }
  0x54   :  { %474 = vmatpush3.bf16.msra.mxu1 %v504_v18 }
  0x55   :  { %475 = vmatprep.subr.bf16.mxu1 %v611_v0 }
  0x56   :  { %456 = vmatpush3.bf16.msra.mxu0 %v497_v8 }
  0x58   :  { %476 = vmatpush3.bf16.msra.mxu1 %v505_v19 }
  0x59   :  { %458 = vmatmul.mubr.bf16.vlgmr.msra.gmra.mrb[0].mxu0 %v75_v11 }
 0x12c   :  { %v174_v20 = vpop.f32.mrb[0].mxu0 }
 0x12d   :  { %v459_v21 = vpop.f32.mrb[1].mxu0  ;;  %v188_v23 = vmul.f32 %v174_v20, %v174_v20 }
 0x12e   :  { %v177_v22 = vpop.f32.mrb[2].mxu0 }
 0x12f   :  { %v181_v24 = vadd.f32 %v177_v22, %v174_v20  ;;  %v189_v25 = vmul.f32 %v177_v22, %v177_v22  ;;  %v460_v26 = vpop.f32.mrb[3].mxu0 }
 0x131   :  { %v182_v27 = vrot.slane %v181_v24, 4  ;;  %v190_v28 = vadd.f32 %v189_v25, %v188_v23 }
 0x133   :  { %v183_v29 = vadd.f32 %v182_v27, %v181_v24  ;;  %v191_v30 = vrot.slane %v190_v28, 4 }
 0x135   :  { %v184_v31 = vrot.slane %v183_v29, 2  ;;  %v192_v32 = vadd.f32 %v191_v30, %v190_v28 }
 0x137   :  { %v185_v33 = vadd.f32 %v184_v31, %v183_v29  ;;  %v193_v34 = vrot.slane %v192_v32, 2 }
 0x139   :  { %v186_v35 = vrot.slane %v185_v33, 1  ;;  %v194_v36 = vadd.f32 %v193_v34, %v192_v32  ;;  %v363_v32 = vsub.s32 2, %v64_v47 }
 0x13b   :  { %v187_v37 = vadd.f32 %v186_v35, %v185_v33  ;;  %v195_v38 = vrot.slane %v194_v36, 1 }
 0x13d   :  { %v196_v39 = vadd.f32 %v195_v38, %v194_v36  ;;  %v197_v40 = vmul.f32 0.07692308, %v187_v37 }
 0x13f   :  { %v198_v41 = vmul.f32 0.07692308, %v196_v39  ;;  %v199_v42 = vmul.f32 %v197_v40, %v197_v40 }
 0x141   :  { %v200_v43 = vsub.f32 %v198_v41, %v199_v42 }
 0x143   :  { %v201_v44 = vmax.f32 %v200_v43, 0.0 }
 0x145   :  { %v202_v45 = vadd.f32 1e-05, %v201_v44 }
 0x147   :  { %506 = vrsqrt.f32 %v202_v45 }
 0x151   :  { %v507_v50 = vpop.eup %506 }
 0x152   :  { %v204_v51 = vmul.f32 %v507_v50, %v74_v48 }
 0x154   :  { %v205_v52 = vmul.f32 %v204_v51, %v197_v40  ;;  %v213_v53 = vrot.slane %v204_v51, %v212_v49  ;;  %v369_v40 = vsub.s32 3, %v64_v47 }
 0x156   :  { %v207_v55 = vrot.slane %v205_v52, 7  ;;  %v214_v56 = vmul.f32 %v213_v53, %v174_v20  ;;  %v215_v57 = vmul.f32 %v213_v53, %v177_v22 }
 0x158   :  { %v209_v59 = vsub.f32 %v74_v48, %v207_v55 }
 0x15a   :  { %v219_v60 = vrot.slane %v209_v59, %v218_v58 }
 0x15c   :  { %v221_v62 = vadd.f32 %v219_v60, %v215_v57  ;;  %v220_v63 = vadd.f32 %v219_v60, %v214_v56 }
 0x15e   :  { %v223_v1 = vmul.f32 %v405_v61, %v221_v62  ;;  %v224_v2 = vmax.f32 %v220_v63, 0.0 }
 0x160   :  { %v225_v3 = vmax.f32 %v223_v1, 0.0 }
 0x162   :  { %v226_v4 = vpack.c.bf16 %v225_v3, %v224_v2 }
 0x164   :  { %478 = vmatmul.mubr.bf16.vlgmr.msra.gmra.mrb[0].mxu1 %v226_v4 }
 0x237   :  { %v325_v5 = vpop.f32.mrb[0].mxu1 }
 0x238   :  { %v479_v6 = vpop.f32.mrb[1].mxu1  ;;  %v339_v8 = vmul.f32 %v325_v5, %v325_v5 }
 0x239   :  { %v328_v7 = vpop.f32.mrb[2].mxu1 }
 0x23a   :  { %v332_v11 = vadd.f32 %v328_v7, %v325_v5  ;;  %v340_v12 = vmul.f32 %v328_v7, %v328_v7  ;;  %v480_v13 = vpop.f32.mrb[3].mxu1 }
 0x23c   :  { %v333_v14 = vrot.slane %v332_v11, 4  ;;  %v341_v15 = vadd.f32 %v340_v12, %v339_v8 }
 0x23e   :  { %v334_v16 = vadd.f32 %v333_v14, %v332_v11  ;;  %v342_v17 = vrot.slane %v341_v15, 4 }
 0x240   :  { %v335_v18 = vrot.slane %v334_v16, 2  ;;  %v343_v0 = vadd.f32 %v342_v17, %v341_v15 }
 0x242   :  { %v336_v19 = vadd.f32 %v335_v18, %v334_v16  ;;  %v344_v20 = vrot.slane %v343_v0, 2 }
 0x244   :  { %v337_v21 = vrot.slane %v336_v19, 1  ;;  %v345_v22 = vadd.f32 %v344_v20, %v343_v0 }
 0x246   :  { %v338_v23 = vadd.f32 %v337_v21, %v336_v19  ;;  %v346_v24 = vrot.slane %v345_v22, 1 }
 0x248   :  { %v347_v25 = vadd.f32 %v346_v24, %v345_v22  ;;  %v348_v26 = vmul.f32 0.07692308, %v338_v23 }
 0x24a   :  { %v349_v27 = vmul.f32 0.07692308, %v347_v25  ;;  %v350_v28 = vmul.f32 %v348_v26, %v348_v26 }
 0x24c   :  { %v351_v29 = vsub.f32 %v349_v27, %v350_v28 }
 0x24e   :  { %v352_v30 = vmax.f32 %v351_v29, 0.0 }
 0x250   :  { %v353_v31 = vadd.f32 1e-05, %v352_v30 }
 0x252   :  { %508 = vrsqrt.f32 %v353_v31 }
 0x25c   :  { %v509_v33 = vpop.eup %508 }
 0x25d   :  { %v355_v34 = vmul.f32 %v509_v33, %v74_v48 }
 0x25f   :  { %v356_v35 = vmul.f32 %v355_v34, %v348_v26  ;;  %v364_v36 = vrot.slane %v355_v34, %v363_v32 }
 0x261   :  { %v358_v37 = vrot.slane %v356_v35, 7  ;;  %v365_v38 = vmul.f32 %v364_v36, %v325_v5  ;;  %v366_v39 = vmul.f32 %v364_v36, %v328_v7 }
 0x263   :  { %v360_v41 = vsub.f32 %v74_v48, %v358_v37 }
 0x265   :  { %v370_v42 = vrot.slane %v360_v41, %v369_v40 }
 0x267   :  { %v371_v43 = vadd.f32 %v370_v42, %v365_v38  ;;  %v372_v44 = vadd.f32 %v370_v42, %v366_v39 }
 0x269   :  { %v374_v45 = vmul.f32 %v405_v61, %v372_v44  ;;  %v375_v46 = vadd.f32 %v371_v43, %v699_v9 }
 0x26b   :  { %v376_v49 = vadd.f32 %v374_v45, %v701_v10  ;;  %v377_v50 = vmax.f32 %v375_v46, 0.0 }
 0x26d   :  { %v378_v51 = vmax.f32 %v376_v49, 0.0  ;;  %379 = vst [vmem:[#allocation8] sm:$0xff] %v377_v50 }
 0x26f   :  { %380 = vst [vmem:[#allocation8 + $0x8] sm:$0xff] %v378_v51 }
 0x270   :  { %587 = shalt.err (!%p679_p9)
}
 0x271   :  { %s588_s28 = scalar_lea.hbm %s738_s4, 256 }
 0x272   :  { %p589_p10 = scmp.ne.s32.totalorder %s738_s4, %s588_s28  ;;  %p592_p11 = scmp.lt.u32.totalorder %s588_s28, %s738_s4 }
 0x274   :  { %p594_p12 = pnand %p592_p11, %p589_p10 }
 0x276   :  { %597 = shalt.err (!%p594_p12)
}
 0x277   :  { %s613_s7 = smov 128   ;;  %s614_s8 = smov 8  }
 0x278   :  { %392 = dma.vmem_to_hbm [thread:$0]  %s664_s15, 256, %s738_s4, [#allocation5], %s613_s7, %s613_s7, %s614_s8  }
 0x279   :  { %604 = dma.done.wait [#allocation5], 256  }
 0x27a   :  { %605 = vsyncadd [#allocation5], 4294967040 }
 0x27b   :  { %396 = vsyncpa [#allocation4], 1 }
 0x27c   :  { %397 = vsyncpa [#allocation7], 1 }
 0x27d   :  { %398 = vsyncpa [#allocation5], 1 }
 0x27e   :  { %399 = vsyncmov [#allocation2] }
 0x281   :  { %s400_s11 = vpop.sfrf %399 }
 0x282   :  { %p422_p13 = scmp.ne.s32.totalorder %s400_s11, 0 }
 0x284   :  { %404 = shalt.err (%p422_p13)  }

</bundles_post_ra>
